<compile_context>
chip_gen: v7x
topology: tpu7x:2x2x1
jax: 0.10.0
libtpu: 0.0.40
codegen_flags: <defaults>
</compile_context>

<pallas_src>
import math
import jax
import jax.numpy as jnp
from jax.experimental import pallas as pl
from jax.experimental.pallas import tpu as pltpu


_FAST_K_MAX = 1024   # in_size threshold for the unpadded single-block path
_FAST_N_MAX = 512    # out_size threshold for the unpadded single-block path
_FAST_M_MAX = 512    # rows per block on the fast path


# ----------------------------- helpers ------------------------------------


def _round_up(x, m):
    return ((x + m - 1) // m) * m


def _choose_tile(extent_pad, candidates, min_tiles=1):
    """Largest candidate tile that exactly divides extent_pad (prefers >= min_tiles tiles)."""
    for t in candidates:
        if extent_pad % t == 0 and extent_pad // t >= min_tiles:
            return t
    for t in candidates:                      # relax the min_tiles preference
        if extent_pad % t == 0:
            return t
    return extent_pad


def _m_tile(batch):
    m_pad = _round_up(batch, 8)
    if m_pad <= 512:
        return m_pad, m_pad                   # single, full-extent M block
    for t in (512, 256, 128, 64, 32, 16, 8):
        if m_pad % t == 0:
            return t, m_pad
    return 8, m_pad                           # unreachable: m_pad is a multiple of 8


# ----------------------------- kernels -------------------------------------


def _fast_linear_kernel(x_ref, w_ref, b_ref, o_ref):
    # x: (tm, K) bf16, w: (K, N) bf16, b: (1, N) f32, o: (tm, N) f32
    acc = jnp.dot(x_ref[...], w_ref[...], preferred_element_type=jnp.float32)
    o_ref[...] = (acc + b_ref[...]).astype(o_ref.dtype)


def _tiled_linear_kernel(x_ref, w_ref, b_ref, o_ref):
    # x: (tm, tk) bf16, w: (tk, tn) bf16, b: (1, tn) f32, o: (tm, tn) f32.
    # The output block index is constant over the K axis, so o_ref stays
    # VMEM-resident across K and doubles as the f32 accumulator (no scratch).
    k = pl.program_id(2)

    @pl.when(k == 0)
    def _():
        o_ref[...] = jnp.broadcast_to(b_ref[...], o_ref.shape)   # fold bias into init

    o_ref[...] += jnp.dot(x_ref[...], w_ref[...],
                          preferred_element_type=jnp.float32)


# ----------------------------- parameter prep ------------------------------


def prepare_params(weight, bias, compute_dtype=jnp.bfloat16):
    """One-time parameter prep (done at init, NOT per forward call).

    weight: (out_size, in_size)  -- PyTorch nn.Linear layout
    bias:   (out_size,)
    """
    weight = jnp.asarray(weight)
    bias = jnp.asarray(bias, jnp.float32)
    out_size, in_size = weight.shape
    w_t = weight.T.astype(compute_dtype)      # (in_size, out_size): one-time transpose + cast

    if in_size <= _FAST_K_MAX and out_size <= _FAST_N_MAX:
        return {
            "mode": "fast",
            "w": w_t,
            "b": bias.reshape(1, out_size),
            "in_size": in_size, "out_size": out_size,
        }

    # General tiled path: pad K/N to multiples of 128 first, then pick tiles
    # that exactly divide the padded extents (no tile-multiple over-padding).
    k_pad = _round_up(in_size, 128)
    n_pad = _round_up(out_size, 128)
    tk = _choose_tile(k_pad, (1024, 512, 256, 128))
    tn = _choose_tile(n_pad, (512, 256, 128), min_tiles=2)   # >=2 N tiles -> v7x megacore
    w_pad = jnp.zeros((k_pad, n_pad), compute_dtype).at[:in_size, :out_size].set(w_t)
    b_pad = jnp.zeros((1, n_pad), jnp.float32).at[0, :out_size].set(bias)
    return {
        "mode": "tiled",
        "w": w_pad, "b": b_pad,
        "in_size": in_size, "out_size": out_size,
        "k_pad": k_pad, "n_pad": n_pad, "tk": tk, "tn": tn,
    }


# ----------------------------- forward paths -------------------------------


def _forward_fast(x, params):
    w, b = params["w"], params["b"]
    in_size, out_size = params["in_size"], params["out_size"]
    batch = x.shape[0]
    cd = w.dtype

    if batch <= _FAST_M_MAX:
        tm, m_pad = batch, batch
        x_c = x.astype(cd)                    # cast only; no padding, no slice
    else:
        tm = _FAST_M_MAX
        m_pad = _round_up(batch, tm)
        x_c = jnp.zeros((m_pad, in_size), cd).at[:batch].set(x.astype(cd))

    grid = (m_pad // tm,)
    out = pl.pallas_call(
        _fast_linear_kernel,
        out_shape=jax.ShapeDtypeStruct((m_pad, out_size), jnp.float32),
        grid_spec=pltpu.PrefetchScalarGridSpec(
            num_scalar_prefetch=0,
            grid=grid,
            in_specs=[
                pl.BlockSpec((tm, in_size), lambda i: (i, 0)),
                pl.BlockSpec((in_size, out_size), lambda i: (0, 0)),
                pl.BlockSpec((1, out_size), lambda i: (0, 0)),
            ],
            out_specs=pl.BlockSpec((tm, out_size), lambda i: (i, 0)),
        ),
        compiler_params=pltpu.CompilerParams(dimension_semantics=("parallel",)),
        cost_estimate=pl.CostEstimate(
            flops=2 * m_pad * in_size * out_size,
            transcendentals=0,
            bytes_accessed=(2 * m_pad * in_size
                            + grid[0] * (2 * in_size * out_size + 4 * out_size)
                            + 4 * m_pad * out_size)),
    )(x_c, w, b)

    return out if m_pad == batch else out[:batch]


def _forward_tiled(x, params):
    w, b = params["w"], params["b"]
    out_size, in_size = params["out_size"], params["in_size"]
    k_pad, n_pad = params["k_pad"], params["n_pad"]
    tk, tn = params["tk"], params["tn"]
    cd = w.dtype

    batch = x.shape[0]
    tm, m_pad = _m_tile(batch)

    if (m_pad, k_pad) == (batch, in_size):
        x_c = x.astype(cd)                    # cast only, no pad needed
    else:
        x_c = jnp.zeros((m_pad, k_pad), cd).at[:batch, :in_size].set(x.astype(cd))

    grid = (m_pad // tm, n_pad // tn, k_pad // tk)

    flops = 2 * m_pad * n_pad * k_pad
    bytes_accessed = (2 * grid[1] * m_pad * k_pad       # x re-read per N tile (bf16)
                      + 2 * grid[0] * n_pad * k_pad     # W re-read per M tile (bf16)
                      + 4 * n_pad + 4 * m_pad * n_pad)  # bias + f32 output

    out_pad = pl.pallas_call(
        _tiled_linear_kernel,
        out_shape=jax.ShapeDtypeStruct((m_pad, n_pad), jnp.float32),
        grid_spec=pltpu.PrefetchScalarGridSpec(
            num_scalar_prefetch=0,
            grid=grid,
            in_specs=[
                pl.BlockSpec((tm, tk), lambda i, j, k: (i, k)),   # x tile
                pl.BlockSpec((tk, tn), lambda i, j, k: (k, j)),   # W^T tile (k, n)
                pl.BlockSpec((1, tn), lambda i, j, k: (0, j)),    # bias, resident per N tile
            ],
            out_specs=pl.BlockSpec((tm, tn), lambda i, j, k: (i, j)),
        ),
        compiler_params=pltpu.CompilerParams(
            dimension_semantics=("parallel", "parallel", "arbitrary"),
            vmem_limit_bytes=32 * 1024 * 1024),
        cost_estimate=pl.CostEstimate(
            flops=flops, transcendentals=0, bytes_accessed=bytes_accessed),
    )(x_c, w, b)

    if (m_pad, n_pad) == (batch, out_size):
        return out_pad
    return out_pad[:batch, :out_size]


def test_model_forward(x, params):
    """Pallas equivalent of Test_Model.forward: output = fc(input)."""
    if params["mode"] == "fast":
        return _forward_fast(x, params)
    return _forward_tiled(x, params)


def init_params(key, input_size, output_size):
    # nn.Linear default init: U(-1/sqrt(in), 1/sqrt(in)).
    kw, kb = jax.random.split(key)
    bound = 1.0 / math.sqrt(input_size)
    weight = jax.random.uniform(kw, (output_size, input_size),
                                minval=-bound, maxval=bound, dtype=jnp.float32)
    bias = jax.random.uniform(kb, (output_size,),
                              minval=-bound, maxval=bound, dtype=jnp.float32)
    return weight, bias


if __name__ == "__main__":
    key = jax.random.PRNGKey(0)
    k_x, k_p, k_x2, k_p2 = jax.random.split(key, 4)

    # --- Actual Test_Model shapes (fast, unpadded single-block path) --------
    batch, input_size, output_size = 8, 32, 16
    x = jax.random.normal(k_x, (batch, input_size), dtype=jnp.float32)
    weight, bias = init_params(k_p, input_size, output_size)
    params = prepare_params(weight, bias)
    assert params["mode"] == "fast"

    out = jax.block_until_ready(test_model_forward(x, params))
    ref = x @ weight.T + bias
    assert out.shape == (batch, output_size)
    assert jnp.allclose(out, ref, atol=2e-2, rtol=2e-2), \
        float(jnp.max(jnp.abs(out - ref)))

    # Mirror the module's informational print.
    print("  In Model: input size", x.shape, "output size", out.shape)

    # --- Exercise the general tiled path as well (still modest shapes) ------
    b2, in2, out2 = 64, 768, 640
    x2 = jax.random.normal(k_x2, (b2, in2), dtype=jnp.float32)
    w2, bias2 = init_params(k_p2, in2, out2)
    params2 = prepare_params(w2, bias2)
    assert params2["mode"] == "tiled"
    y2 = jax.block_until_ready(test_model_forward(x2, params2))
    ref2 = x2 @ w2.T + bias2
    assert y2.shape == (b2, out2)
    assert jnp.allclose(y2, ref2, atol=3e-2, rtol=3e-2), \
        float(jnp.max(jnp.abs(y2 - ref2)))

    print("KERNEL_OK")
</pallas_src>

<mosaic_0001>
module attributes {stable_mosaic.version = 11 : i64} {
  func.func @_fast_linear_kernel(%arg0: i32, %arg1: memref<8x32xbf16, #tpu.memory_space<vmem>>, %arg2: memref<32x16xbf16, #tpu.memory_space<vmem>>, %arg3: memref<1x16xf32, #tpu.memory_space<vmem>>, %arg4: memref<8x16xf32, #tpu.memory_space<vmem>>) attributes {dimension_semantics = [#tpu.dimension_semantics<parallel>], iteration_bounds = array<i64: 1>, scalar_prefetch = 0 : i64, scratch_operands = 0 : i64, tpu.core_type = #tpu.core_type<tc>, window_params = [{transform_indices = @transform_0, window_bounds = array<i64: 8, 32>}, {pipeline_mode = #tpu.pipeline_mode<synchronous>, transform_indices = @transform_1, window_bounds = array<i64: 32, 16>}, {pipeline_mode = #tpu.pipeline_mode<synchronous>, transform_indices = @transform_2, window_bounds = array<i64: 1, 16>}, {transform_indices = @transform_3, window_bounds = array<i64: 8, 16>}]} {
    %c0 = arith.constant 0 : index
    %c0_0 = arith.constant 0 : index
    %0 = vector.load %arg1[%c0, %c0_0] : memref<8x32xbf16, #tpu.memory_space<vmem>>, vector<8x32xbf16>
    %c0_1 = arith.constant 0 : index
    %c0_2 = arith.constant 0 : index
    %1 = vector.load %arg2[%c0_1, %c0_2] : memref<32x16xbf16, #tpu.memory_space<vmem>>, vector<32x16xbf16>
    %cst = arith.constant dense<0.000000e+00> : vector<8x16xf32>
    %2 = tpu.matmul %0, %1, %cst {dimension_numbers = #tpu.dot_dimension_numbers<[1], [0], [0], [1], [0, 0, 1, 1], [], []>} : vector<8x32xbf16>, vector<32x16xbf16>, vector<8x16xf32> -> vector<8x16xf32>
    %c0_3 = arith.constant 0 : index
    %c0_4 = arith.constant 0 : index
    %3 = vector.load %arg3[%c0_3, %c0_4] : memref<1x16xf32, #tpu.memory_space<vmem>>, vector<1x16xf32>
    %4 = vector.broadcast %3 : vector<1x16xf32> to vector<8x16xf32>
    %5 = arith.addf %2, %4 : vector<8x16xf32>
    %c0_5 = arith.constant 0 : index
    %c0_6 = arith.constant 0 : index
    %6 = vector.load %arg4[%c0_5, %c0_6] : memref<8x16xf32, #tpu.memory_space<vmem>>, vector<8x16xf32>
    tpu.vector_store %arg4[%c0_5, %c0_6], %5 {strides = array<i32>} : memref<8x16xf32, #tpu.memory_space<vmem>>, vector<8x16xf32>,
    return
  }
  func.func @transform_0(%arg0: i32) -> (i32, i32) {
    %c0_i32 = arith.constant 0 : i32
    %c0_i32_0 = arith.constant 0 : i32
    return %arg0, %c0_i32 : i32, i32
  }
  func.func @transform_1(%arg0: i32) -> (i32, i32) {
    %c0_i32 = arith.constant 0 : i32
    %c0_i32_0 = arith.constant 0 : i32
    %c0_i32_1 = arith.constant 0 : i32
    return %c0_i32, %c0_i32_0 : i32, i32
  }
  func.func @transform_2(%arg0: i32) -> (i32, i32) {
    %c0_i32 = arith.constant 0 : i32
    %c0_i32_0 = arith.constant 0 : i32
    %c0_i32_1 = arith.constant 0 : i32
    return %c0_i32, %c0_i32_0 : i32, i32
  }
  func.func @transform_3(%arg0: i32) -> (i32, i32) {
    %c0_i32 = arith.constant 0 : i32
    %c0_i32_0 = arith.constant 0 : i32
    return %arg0, %c0_i32 : i32, i32
  }
}

</mosaic_0001>

<bundles_post_ra>
// kernel: tpu_custom_call.1
= control target key start
LH: loop header
LB: loop body
LE: loop exit
PB: predicated region body
PF: predicated region fallthrough
CT: control target
= control target key end

     0   :  { %v144_v1 = vmov 0.0   ;;  %vm145_vm0 = vmmov 0   ;;  %s191_s0 = inlined_call_operand.vmem [shape: bf16[8,32], index: 0, kind: input, shape index: {}]   ;;  %s192_s1 = inlined_call_operand.vmem [shape: bf16[32,16], index: 1, kind: input, shape index: {}]   ;;  %s193_s2 = inlined_call_operand.vmem [shape: f32[1,16], index: 2, kind: input, shape index: {}]   ;;  %s194_s3 = inlined_call_operand.hbm [shape: f32[8,16], index: 3, kind: output, shape index: {}]  }
   0x1   :  { %v118_v0 = vld [vmem:[%s192_s1] sm:$0xff]   ;;  %107 = vmatprep.subr.bf16.mxu0 %v144_v1  ;;  %v119_v2 = vld [vmem:[%s192_s1 + $0x8] sm:$0xff]   ;;  %111 = vmatprep.mubr.msk.bf16.mxu0 %vm145_vm0, %v144_v1 }
   0x2   :  { %108 = vmatpush3.bf16.msra.mxu0 %v118_v0 }
   0x3   :  { %109 = vmatprep.subr.bf16.mxu0 %v144_v1 }
   0x4   :  { %8 = vsyncpa [#allocation3], 0  ;;  %v16_v3 = vld [vmem:[%s191_s0] sm:$0xf]  ;;  %vm40_vm1 = vcmask 261120   ;;  %s146_s20 = smov [#allocation2]  }
   0x5   :  { %v100_v4 = vld [vmem:[%s193_s2] ss:$0 sm:$0xff]  ;;  %s92_s21 = sshll.u32 %s146_s20, 4  ;;  %vm84_vm2 = vcmask 130048   ;;  %s93_s21 = int_to_ptr.vmem [resolvable:$true] %s92_s21 }
   0x6   :  { %110 = vmatpush3.bf16.msra.mxu0 %v119_v2  ;;  %s120_s1 = scalar_lea.vmem %s93_s21, 128  ;;  %p125_p1 = scmp.lt.s32.totalorder %s93_s21, %s93_s21 }
   0x7   :  { %p121_p0 = scmp.ne.s32.totalorder %s93_s21, %s120_s1  ;;  %p126_p2 = scmp.lt.s32.totalorder %s120_s1, %s120_s1 }
   0x9   :  { %112 = vmatmul.mubr.msk.bf16.vlgmr.msra.gmra.mrb[0].mxu0 %vm40_vm1, %v16_v3  ;;  %p127_p3 = por %p126_p2, %p125_p1 }
   0xb   :  { %p128_p4 = pnand %p127_p3, %p121_p0 }
  0xdc   :  { %v78_v5 = vpop.f32.mrb[0].mxu0 }
  0xdd   :  { %v79_v6 = vadd.f32 %v100_v4, %v78_v5  ;;  %v113_v7 = vpop.f32.mrb[1].mxu0 }
  0xde   :  { %v81_v8 = vpop.f32.mrb[2].mxu0 }
  0xdf   :  { %v114_v9 = vpop.f32.mrb[3].mxu0  ;;  %85 = vst.msk [vmem:[#allocation2] sm:$0xff] %vm84_vm2, %v79_v6 }
  0xe0   :  { %131 = shalt.err (!%p128_p4)
}
  0xe1   :  { %s132_s2 = scalar_lea.hbm %s194_s3, 128 }
  0xe2   :  { %p133_p5 = scmp.ne.s32.totalorder %s194_s3, %s132_s2  ;;  %p136_p6 = scmp.lt.u32.totalorder %s132_s2, %s194_s3 }
  0xe4   :  { %p138_p7 = pnand %p136_p6, %p133_p5 }
  0xe6   :  { %141 = shalt.err (!%p138_p7)
}
  0xe7   :  { %95 = dma.vmem_to_hbm [thread:$0]  %s93_s21, 128, %s194_s3, [#allocation3]  }
  0xe8   :  { %142 = dma.done.wait [#allocation3], 128  }
  0xe9   :  { %143 = vsyncadd [#allocation3], 4294967168 }
  0xea   :  { %99 = vsyncpa [#allocation3], 1 }

</bundles_post_ra>
